<compile_context>
chip_gen: v7x
topology: tpu7x:2x2x1
jax: 0.10.0
libtpu: 0.0.40
codegen_flags: <defaults>
</compile_context>

<pallas_src>
import functools

import jax
import jax.numpy as jnp
from jax.experimental import pallas as pl
from jax.experimental.pallas import tpu as pltpu


_NEG_BIG = -1.0e30   # "minus infinity" bias for padded logit columns (no inf math)


def _round_up(x, m):
    return (x + m - 1) // m * m


def _fbnet_kernel(x_ref, w1_ref, b1_ref, w2_ref, b2_ref, o_ref, *, out_f):
    """One batch tile: x[TB,Cin] @ W1 -> ReLU -> @ W2 -> log_softmax, all in VMEM.

    Only the first `out_f` (real) class columns are stored back to HBM."""
    w1 = w1_ref[...]                                     # [Cin, Hp]
    w2 = w2_ref[...]                                     # [Hp,  Op]

    # MXU matmul #1; x already in the weights' dtype (wrapper casts), f32 acc.
    h = jnp.dot(x_ref[...], w1, preferred_element_type=jnp.float32)   # [TB, Hp]
    h = jnp.maximum(h + b1_ref[...], 0.0)                # f32 bias + ReLU

    # MXU matmul #2; zero-padded hidden rows of W2 are inert.
    logits = jnp.dot(h.astype(w2.dtype), w2,
                     preferred_element_type=jnp.float32)               # [TB, Op]
    logits = logits + b2_ref[...]                        # padded cols -> ~-1e30

    # Stable log-softmax over the lane-dense padded class axis (exp(-1e30) == 0,
    # so padded columns don't perturb the sum).
    m = jnp.max(logits, axis=-1, keepdims=True)
    shifted = logits - m
    lse = jnp.log(jnp.sum(jnp.exp(shifted), axis=-1, keepdims=True))

    # Narrow store: only the real classes leave VMEM (masked vst on a tiny slice).
    o_ref[...] = (shifted - lse)[:, :out_f].astype(o_ref.dtype)


def prepare_params(w1, b1, w2, b2):
    """Lane-pad hidden/out feature dims to multiples of 128 ONCE (hoisted out of
    the per-call path).  Returns (w1p, b1p, w2p, b2p, out_f).

    Pass bf16 w1/w2 for the bf16 MXU fast path on any generation (v5e included);
    the biases are kept f32 since the epilogue runs in f32."""
    hidden, out_f = w1.shape[1], w2.shape[1]
    hp, op = _round_up(hidden, 128), _round_up(out_f, 128)
    w1p = jnp.pad(w1, ((0, 0), (0, hp - hidden)))
    b1p = jnp.pad(b1.astype(jnp.float32), ((0, 0), (0, hp - hidden)))
    w2p = jnp.pad(w2, ((0, hp - hidden), (0, op - out_f)))
    b2p = jnp.pad(b2.astype(jnp.float32), ((0, 0), (0, op - out_f)),
                  constant_values=_NEG_BIG)
    return w1p, b1p, w2p, b2p, out_f


def fbnet_forward_prepared(x, w1p, b1p, w2p, b2p, out_f, *,
                           block_batch=1024, out_dtype=jnp.float32):
    """Forward pass from pre-padded params.  x:[B,Cin]; returns [B,out_f]."""
    batch, cin = x.shape
    hp, op = w1p.shape[1], w2p.shape[1]

    # Cast activations to the weights' dtype in the wrapper (halves x HBM read
    # traffic with bf16 weights and removes a per-tile pack from the kernel).
    x = x.astype(w1p.dtype)

    # Batch tiling: TB multiple of 8, capped so the grid keeps >= 4 steps when
    # the batch is large enough (lets the "parallel" axis use both v7x TCs).
    pb8 = max(_round_up(batch, 8), 8)
    tb = min(block_batch, max(8, _round_up(pl.cdiv(pb8, 4), 8)))
    tb = _round_up(tb, 8)
    pb = _round_up(batch, tb)
    xp = jnp.pad(x, ((0, pb - batch), (0, 0)))
    grid = (pl.cdiv(pb, tb),)

    # Generation-aware VMEM budget: resident weights (x2: the pipeline may still
    # double-buffer constant-index blocks) + double-buffered x/out tiles +
    # in-kernel f32 intermediates + headroom, clamped to physical capacity.
    out_isize = jnp.dtype(out_dtype).itemsize
    resident = w1p.nbytes + b1p.nbytes + w2p.nbytes + b2p.nbytes
    x_tile = tb * cin * xp.dtype.itemsize
    out_tile = tb * out_f * out_isize
    work = 2 * tb * (hp + op) * 4                       # h / logits f32 temps
    try:
        vmem_cap = int(pltpu.get_tpu_info().vmem_capacity_bytes)
    except Exception:                                   # pragma: no cover
        vmem_cap = 64 * 1024 * 1024                     # conservative (v7x)
    vmem_limit = 2 * resident + 2 * (x_tile + out_tile) + work + (2 << 20)
    vmem_limit = int(min(max(vmem_limit, 8 << 20), int(vmem_cap * 0.9)))

    cost = pl.CostEstimate(
        flops=2 * pb * (cin * hp + hp * op),
        transcendentals=pb * (op + 1),
        bytes_accessed=xp.nbytes + resident + pb * out_f * out_isize,
    )

    out = pl.pallas_call(
        functools.partial(_fbnet_kernel, out_f=out_f),
        out_shape=jax.ShapeDtypeStruct((pb, out_f), out_dtype),
        grid=grid,
        in_specs=[
            pl.BlockSpec((tb, cin), lambda i: (i, 0)),   # x: tiled over batch
            pl.BlockSpec((cin, hp), lambda i: (0, 0)),   # W1: VMEM-resident
            pl.BlockSpec((1, hp),   lambda i: (0, 0)),   # b1: VMEM-resident
            pl.BlockSpec((hp, op),  lambda i: (0, 0)),   # W2: VMEM-resident
            pl.BlockSpec((1, op),   lambda i: (0, 0)),   # b2: VMEM-resident
        ],
        out_specs=pl.BlockSpec((tb, out_f), lambda i: (i, 0)),   # real cols only
        compiler_params=pltpu.CompilerParams(
            dimension_semantics=("parallel",),           # shard batch over v7x TCs
            vmem_limit_bytes=vmem_limit,
        ),
        cost_estimate=cost,
    )(xp, w1p, b1p, w2p, b2p)

    return out[:batch, :]


def fbnet_forward(x, w1, b1, w2, b2, *, block_batch=1024,
                  out_dtype=jnp.float32):
    """Convenience wrapper: pads per call.  For repeated inference, call
    prepare_params() once and use fbnet_forward_prepared()."""
    w1p, b1p, w2p, b2p, out_f = prepare_params(w1, b1, w2, b2)
    return fbnet_forward_prepared(x, w1p, b1p, w2p, b2p, out_f,
                                  block_batch=block_batch, out_dtype=out_dtype)


def init_params(key, in_channels, hidden_channels, output_channels):
    # Deterministic synthetic init (PyTorch-style uniform ranges).
    k1, k2, k3, k4 = jax.random.split(key, 4)
    bound1 = 1.0 / jnp.sqrt(in_channels)
    bound2 = 1.0 / jnp.sqrt(hidden_channels)
    w1 = jax.random.uniform(k1, (in_channels, hidden_channels),
                            jnp.float32, -bound1, bound1)
    b1 = jax.random.uniform(k2, (1, hidden_channels),
                            jnp.float32, -bound1, bound1)
    w2 = jax.random.uniform(k3, (hidden_channels, output_channels),
                            jnp.float32, -bound2, bound2)
    b2 = jax.random.uniform(k4, (1, output_channels),
                            jnp.float32, -bound2, bound2)
    return w1, b1, w2, b2


def _reference(x, w1, b1, w2, b2):
    h = jnp.maximum(x @ w1 + b1, 0.0)
    return jax.nn.log_softmax(h @ w2 + b2, axis=1)


if __name__ == "__main__":
    # fizzbuzz-style shapes: 10-bit binary encoding -> 4 classes.
    batch, in_channels, hidden_channels, output_channels = 8, 10, 32, 4

    key = jax.random.PRNGKey(0)
    kx, kp, kx2 = jax.random.split(key, 3)
    x = jax.random.normal(kx, (batch, in_channels), jnp.float32)
    w1, b1, w2, b2 = init_params(kp, in_channels, hidden_channels,
                                 output_channels)

    # --- 1) small batch, f32 weights (matches the original module exactly) ----
    out = jax.block_until_ready(fbnet_forward(x, w1, b1, w2, b2))
    ref = _reference(x, w1, b1, w2, b2)
    assert out.shape == (batch, output_channels)
    assert jnp.allclose(out, ref, atol=1e-5, rtol=1e-5), "f32 small-batch mismatch"

    # --- 2) larger, non-multiple-of-tile batch exercises the batch grid -------
    #     (pb=1024, tb=256 -> 4 grid steps -> megacore-shardable on v7x) and
    #     reuses prepared (pre-padded) params across calls.
    w1p, b1p, w2p, b2p, out_f = prepare_params(w1, b1, w2, b2)
    big_batch = 1000
    xb = jax.random.normal(kx2, (big_batch, in_channels), jnp.float32)
    out_b = jax.block_until_ready(
        fbnet_forward_prepared(xb, w1p, b1p, w2p, b2p, out_f, block_batch=256))
    ref_b = _reference(xb, w1, b1, w2, b2)
    assert out_b.shape == (big_batch, output_channels)
    assert jnp.allclose(out_b, ref_b, atol=1e-4, rtol=1e-4), "f32 tiled mismatch"
    # second call with the same prepared params (no re-padding)
    out_b2 = jax.block_until_ready(
        fbnet_forward_prepared(xb, w1p, b1p, w2p, b2p, out_f, block_batch=256))
    assert jnp.allclose(out_b2, ref_b, atol=1e-4, rtol=1e-4), "reuse mismatch"

    # --- 3) bf16 matmul operands (fast path on all generations), f32 epilogue -
    out_bf16 = jax.block_until_ready(
        fbnet_forward(x, w1.astype(jnp.bfloat16), b1,
                      w2.astype(jnp.bfloat16), b2))
    h_bf = jnp.maximum(
        jnp.dot(x.astype(jnp.bfloat16), w1.astype(jnp.bfloat16),
                preferred_element_type=jnp.float32) + b1, 0.0)
    logits_bf = jnp.dot(h_bf.astype(jnp.bfloat16), w2.astype(jnp.bfloat16),
                        preferred_element_type=jnp.float32) + b2
    ref_bf16 = jax.nn.log_softmax(logits_bf, axis=1)
    assert jnp.allclose(out_bf16, ref_bf16, atol=2e-2, rtol=2e-2), "bf16 mismatch"

    print("KERNEL_OK")
</pallas_src>

<mosaic_0001>
module attributes {stable_mosaic.version = 11 : i64} {
  func.func @_fbnet_kernel(%arg0: i32, %arg1: memref<8x10xf32, #tpu.memory_space<vmem>>, %arg2: memref<10x128xf32, #tpu.memory_space<vmem>>, %arg3: memref<1x128xf32, #tpu.memory_space<vmem>>, %arg4: memref<128x128xf32, #tpu.memory_space<vmem>>, %arg5: memref<1x128xf32, #tpu.memory_space<vmem>>, %arg6: memref<8x4xf32, #tpu.memory_space<vmem>>) attributes {dimension_semantics = [#tpu.dimension_semantics<parallel>], iteration_bounds = array<i64: 1>, scalar_prefetch = 0 : i64, scratch_operands = 0 : i64, tpu.core_type = #tpu.core_type<tc>, window_params = [{transform_indices = @transform_0, window_bounds = array<i64: 8, 10>}, {pipeline_mode = #tpu.pipeline_mode<synchronous>, transform_indices = @transform_1, window_bounds = array<i64: 10, 128>}, {pipeline_mode = #tpu.pipeline_mode<synchronous>, transform_indices = @transform_2, window_bounds = array<i64: 1, 128>}, {pipeline_mode = #tpu.pipeline_mode<synchronous>, transform_indices = @transform_3, window_bounds = array<i64: 128, 128>}, {pipeline_mode = #tpu.pipeline_mode<synchronous>, transform_indices = @transform_4, window_bounds = array<i64: 1, 128>}, {transform_indices = @transform_5, window_bounds = array<i64: 8, 4>}]} {
    %c0 = arith.constant 0 : index
    %c0_0 = arith.constant 0 : index
    %0 = vector.load %arg2[%c0, %c0_0] : memref<10x128xf32, #tpu.memory_space<vmem>>, vector<10x128xf32>
    %c0_1 = arith.constant 0 : index
    %c0_2 = arith.constant 0 : index
    %1 = vector.load %arg4[%c0_1, %c0_2] : memref<128x128xf32, #tpu.memory_space<vmem>>, vector<128x128xf32>
    %c0_3 = arith.constant 0 : index
    %c0_4 = arith.constant 0 : index
    %2 = vector.load %arg1[%c0_3, %c0_4] : memref<8x10xf32, #tpu.memory_space<vmem>>, vector<8x10xf32>
    %cst = arith.constant dense<0.000000e+00> : vector<8x128xf32>
    %3 = tpu.matmul %2, %0, %cst {dimension_numbers = #tpu.dot_dimension_numbers<[1], [0], [0], [1], [0, 0, 1, 1], [], []>} : vector<8x10xf32>, vector<10x128xf32>, vector<8x128xf32> -> vector<8x128xf32>
    %c0_5 = arith.constant 0 : index
    %c0_6 = arith.constant 0 : index
    %4 = vector.load %arg3[%c0_5, %c0_6] : memref<1x128xf32, #tpu.memory_space<vmem>>, vector<1x128xf32>
    %5 = vector.broadcast %4 : vector<1x128xf32> to vector<8x128xf32>
    %6 = arith.addf %3, %5 : vector<8x128xf32>
    %cst_7 = arith.constant 0.000000e+00 : f32
    %7 = vector.broadcast %cst_7 : f32 to vector<8x128xf32>
    %8 = arith.maximumf %6, %7 : vector<8x128xf32>
    %cst_8 = arith.constant dense<0.000000e+00> : vector<8x128xf32>
    %9 = tpu.matmul %8, %1, %cst_8 {dimension_numbers = #tpu.dot_dimension_numbers<[1], [0], [0], [1], [0, 0, 1, 1], [], []>} : vector<8x128xf32>, vector<128x128xf32>, vector<8x128xf32> -> vector<8x128xf32>
    %c0_9 = arith.constant 0 : index
    %c0_10 = arith.constant 0 : index
    %10 = vector.load %arg5[%c0_9, %c0_10] : memref<1x128xf32, #tpu.memory_space<vmem>>, vector<1x128xf32>
    %11 = vector.broadcast %10 : vector<1x128xf32> to vector<8x128xf32>
    %12 = arith.addf %9, %11 : vector<8x128xf32>
    %cst_11 = arith.constant dense<0xFF800000> : vector<8xf32>
    %13 = vector.multi_reduction <maximumf>, %12, %cst_11 [1] : vector<8x128xf32> to vector<8xf32>
    %14 = vector.shape_cast %13 : vector<8xf32> to vector<8x1xf32>
    %15 = vector.broadcast %14 : vector<8x1xf32> to vector<8x128xf32>
    %16 = arith.subf %12, %15 : vector<8x128xf32>
    %17 = math.exp %16 : vector<8x128xf32>
    %cst_12 = arith.constant dense<0.000000e+00> : vector<8xf32>
    %18 = vector.multi_reduction <add>, %17, %cst_12 [1] : vector<8x128xf32> to vector<8xf32>
    %19 = vector.shape_cast %18 : vector<8xf32> to vector<8x1xf32>
    %20 = math.log %19 : vector<8x1xf32>
    %21 = vector.broadcast %20 : vector<8x1xf32> to vector<8x128xf32>
    %22 = arith.subf %16, %21 : vector<8x128xf32>
    %23 = vector.extract_strided_slice %22 {offsets = [0, 0], sizes = [8, 4], strides = [1, 1]} : vector<8x128xf32> to vector<8x4xf32>
    %c0_13 = arith.constant 0 : index
    %c0_14 = arith.constant 0 : index
    %24 = vector.load %arg6[%c0_13, %c0_14] : memref<8x4xf32, #tpu.memory_space<vmem>>, vector<8x4xf32>
    tpu.vector_store %arg6[%c0_13, %c0_14], %23 {strides = array<i32>} : memref<8x4xf32, #tpu.memory_space<vmem>>, vector<8x4xf32>,
    return
  }
  func.func @transform_0(%arg0: i32) -> (i32, i32) {
    %c0_i32 = arith.constant 0 : i32
    %c0_i32_0 = arith.constant 0 : i32
    return %arg0, %c0_i32 : i32, i32
  }
  func.func @transform_1(%arg0: i32) -> (i32, i32) {
    %c0_i32 = arith.constant 0 : i32
    %c0_i32_0 = arith.constant 0 : i32
    %c0_i32_1 = arith.constant 0 : i32
    return %c0_i32, %c0_i32_0 : i32, i32
  }
  func.func @transform_2(%arg0: i32) -> (i32, i32) {
    %c0_i32 = arith.constant 0 : i32
    %c0_i32_0 = arith.constant 0 : i32
    %c0_i32_1 = arith.constant 0 : i32
    return %c0_i32, %c0_i32_0 : i32, i32
  }
  func.func @transform_3(%arg0: i32) -> (i32, i32) {
    %c0_i32 = arith.constant 0 : i32
    %c0_i32_0 = arith.constant 0 : i32
    %c0_i32_1 = arith.constant 0 : i32
    return %c0_i32, %c0_i32_0 : i32, i32
  }
  func.func @transform_4(%arg0: i32) -> (i32, i32) {
    %c0_i32 = arith.constant 0 : i32
    %c0_i32_0 = arith.constant 0 : i32
    %c0_i32_1 = arith.constant 0 : i32
    return %c0_i32, %c0_i32_0 : i32, i32
  }
  func.func @transform_5(%arg0: i32) -> (i32, i32) {
    %c0_i32 = arith.constant 0 : i32
    %c0_i32_0 = arith.constant 0 : i32
    return %arg0, %c0_i32 : i32, i32
  }
}

</mosaic_0001>

<bundles_post_ra>
// kernel: tpu_custom_call.1
= control target key start
LH: loop header
LB: loop body
LE: loop exit
PB: predicated region body
PF: predicated region fallthrough
CT: control target
= control target key end

     0   :  { %10 = vsyncpa [#allocation3], 0  ;;  %s526_s0 = inlined_call_operand.hbm [shape: f32[8,10], index: 0, kind: input, shape index: {}]   ;;  %s527_s1 = inlined_call_operand.hbm [shape: f32[10,128], index: 1, kind: input, shape index: {}]   ;;  %s528_s2 = inlined_call_operand.vmem [shape: f32[1,128], index: 2, kind: input, shape index: {}]   ;;  %s529_s3 = inlined_call_operand.hbm [shape: f32[128,128], index: 3, kind: input, shape index: {}]   ;;  %s530_s4 = inlined_call_operand.vmem [shape: f32[1,128], index: 4, kind: input, shape index: {}]   ;;  %s531_s5 = inlined_call_operand.vmem [shape: f32[8,4], index: 5, kind: output, shape index: {}]  }
   0x1   :  { %11 = vsyncpa [#allocation5], 0  ;;  %s436_s18 = smov [#allocation4]   ;;  %s366_s22 = scalar_lea.hbm %s527_s1, 256 }
   0x2   :  { %s27_s19 = sshll.u32 %s436_s18, 4  ;;  %p367_p0 = scmp.ne.s32.totalorder %s527_s1, %s366_s22  ;;  %s28_s19 = int_to_ptr.vmem [resolvable:$true] %s27_s19 }
   0x3   :  { %p370_p1 = scmp.lt.u32.totalorder %s366_s22, %s527_s1 }
   0x5   :  { %p372_p2 = pnand %p370_p1, %p367_p0 }
   0x7   :  { %375 = shalt.err (!%p372_p2)
}
   0x8   :  { %s376_s27 = scalar_lea.vmem %s28_s19, 256  ;;  %p381_p4 = scmp.lt.s32.totalorder %s28_s19, %s28_s19 }
   0x9   :  { %p377_p3 = scmp.ne.s32.totalorder %s28_s19, %s376_s27  ;;  %p382_p5 = scmp.lt.s32.totalorder %s376_s27, %s376_s27 }
   0xb   :  { %p383_p6 = por %p382_p5, %p381_p4 }
   0xd   :  { %p384_p7 = pnand %p383_p6, %p377_p3 }
   0xf   :  { %387 = shalt.err (!%p384_p7)
}
  0x10   :  { %s437_s28 = smov 128   ;;  %s438_s29 = smov 8  }
  0x11   :  { %33 = dma.hbm_to_vmem [thread:$0]  %s527_s1, 256, %s28_s19, [#allocation5], %s437_s28, %s437_s28, %s438_s29  }
  0x12   :  { %s439_s7 = smov [#allocation2]   ;;  %s440_s9 = smov [#allocation6]  }
  0x13   :  { %s18_s8 = sshll.u32 %s439_s7, 4  ;;  %s41_s10 = sshll.u32 %s440_s9, 4  ;;  %s19_s8 = int_to_ptr.vmem [resolvable:$true] %s18_s8  ;;  %s42_s10 = int_to_ptr.vmem [resolvable:$true] %s41_s10 }
  0x14   :  { %s388_s13 = scalar_lea.hbm %s526_s0, 128 }
  0x15   :  { %p389_p8 = scmp.ne.s32.totalorder %s526_s0, %s388_s13  ;;  %p392_p9 = scmp.lt.u32.totalorder %s388_s13, %s526_s0 }
  0x17   :  { %p394_p10 = pnand %p392_p9, %p389_p8 }
  0x19   :  { %397 = shalt.err (!%p394_p10)
}
  0x1a   :  { %s398_s1 = scalar_lea.vmem %s19_s8, 128  ;;  %p403_p12 = scmp.lt.s32.totalorder %s19_s8, %s19_s8 }
  0x1b   :  { %p399_p11 = scmp.ne.s32.totalorder %s19_s8, %s398_s1  ;;  %p404_p13 = scmp.lt.s32.totalorder %s398_s1, %s398_s1 }
  0x1d   :  { %p405_p0 = por %p404_p13, %p403_p12 }
  0x1f   :  { %p406_p1 = pnand %p405_p0, %p399_p11 }
  0x21   :  { %409 = shalt.err (!%p406_p1)
}
  0x22   :  { %21 = dma.hbm_to_vmem [thread:$0]  %s526_s0, 128, %s19_s8, [#allocation3]  }
  0x23   :  { %s410_s22 = scalar_lea.hbm %s529_s3, 2048 }
  0x24   :  { %p411_p2 = scmp.ne.s32.totalorder %s529_s3, %s410_s22  ;;  %p414_p3 = scmp.lt.u32.totalorder %s410_s22, %s529_s3 }
  0x26   :  { %p416_p4 = pnand %p414_p3, %p411_p2 }
  0x28   :  { %419 = shalt.err (!%p416_p4)
}
  0x29   :  { %s420_s27 = scalar_lea.vmem %s42_s10, 2048  ;;  %p425_p6 = scmp.lt.s32.totalorder %s42_s10, %s42_s10 }
  0x2a   :  { %p421_p5 = scmp.ne.s32.totalorder %s42_s10, %s420_s27  ;;  %p426_p7 = scmp.lt.s32.totalorder %s420_s27, %s420_s27 }
  0x2c   :  { %p427_p8 = por %p426_p7, %p425_p6 }
  0x2e   :  { %p428_p9 = pnand %p427_p8, %p421_p5 }
  0x30   :  { %431 = shalt.err (!%p428_p9)
}
  0x31   :  { %47 = dma.hbm_to_vmem [thread:$0]  %s529_s3, 2048, %s42_s10, [#allocation5], %s437_s28, %s437_s28, %s438_s29  }
  0x32   :  { %432 = dma.done.wait [#allocation3], 128  }
  0x33   :  { %433 = vsyncadd [#allocation3], 4294967168 }
  0x34   :  { %434 = dma.done.wait [#allocation5], 2304  }
  0x35   :  { %435 = vsyncadd [#allocation5], 4294964992  ;;  %v441_v0 = vmov 0.0|0.0   ;;  %vm442_vm0 = vmmov 0   ;;  %v443_v1 = vmov 0.0   ;;  %vm89_vm1 = vcmask 1041408  }
  0x36   :  { %325 = vmatprep.subr.bf16.mxu0 %v441_v0  ;;  %329 = vmatprep.subr.bf16.mxu1 %v441_v0  ;;  %v59_v2 = vld [vmem:[#allocation4] sm:$0xff]  ;;  %v60_v3 = vld [vmem:[#allocation4 + $0x8] sm:$0x3]  ;;  %vm444_vm2 = vmmov 1   ;;  %v61_v5 = vld [vmem:[#allocation6] sm:$0xff]  ;;  %vm85_vm4 = vcmask 80896  }
  0x37   :  { %287 = vmatprep.mubr.msk.f32.mxu0 %vm442_vm0, %v443_v1  ;;  %322 = vmatprep.mubr.msk.f32.mxu1 %vm442_vm0, %v443_v1  ;;  %vm327_vm3 = vmpackc.low %vm89_vm1, %vm444_vm2  ;;  %v326_v4 = vpack.c.bf16 %v60_v3, %v59_v2  ;;  %v62_v6 = vld [vmem:[#allocation6 + $0x8] sm:$0xff]  ;;  %v63_v7 = vld [vmem:[#allocation6 + $0x10] sm:$0xff]  ;;  %vm251_vm5 = vcmask 31744  }
  0x38   :  { %v330_v8 = vpack.c.bf16 %v62_v6, %v61_v5  ;;  %v64_v9 = vld [vmem:[#allocation6 + $0x18] sm:$0xff]  ;;  %v77_v10 = vld [vmem:[#allocation2] sm:$0xff]  ;;  %v65_v12 = vld [vmem:[#allocation6 + $0x20] sm:$0xff] }
  0x39   :  { %328 = vmatpush3.bf16.msk.msra.mxu0 %vm327_vm3, %v326_v4  ;;  %v333_v11 = vpack.c.bf16 %v64_v9, %v63_v7  ;;  %v66_v13 = vld [vmem:[#allocation6 + $0x28] sm:$0xff]  ;;  %v67_v15 = vld [vmem:[#allocation6 + $0x30] sm:$0xff]  ;;  %v68_v16 = vld [vmem:[#allocation6 + $0x38] sm:$0xff] }
  0x3a   :  { %331 = vmatpush3.bf16.msra.mxu1 %v330_v8  ;;  %v336_v14 = vpack.c.bf16 %v66_v13, %v65_v12  ;;  %v339_v17 = vpack.c.bf16 %v68_v16, %v67_v15  ;;  %v69_v18 = vld [vmem:[#allocation6 + $0x40] sm:$0xff]  ;;  %v70_v19 = vld [vmem:[#allocation6 + $0x48] sm:$0xff]  ;;  %v71_v21 = vld [vmem:[#allocation6 + $0x50] sm:$0xff] }
  0x3b   :  { %332 = vmatprep.subr.bf16.mxu1 %v441_v0  ;;  %v342_v20 = vpack.c.bf16 %v70_v19, %v69_v18  ;;  %v72_v22 = vld [vmem:[#allocation6 + $0x58] sm:$0xff]  ;;  %v73_v24 = vld [vmem:[#allocation6 + $0x60] sm:$0xff]  ;;  %v74_v25 = vld [vmem:[#allocation6 + $0x68] sm:$0xff] }
  0x3c   :  { %288 = vmatmul.mubr.msk.f32.vlgmr.msra.gmra.mrb[0].mxu0 %vm85_vm4, %v77_v10  ;;  %v345_v23 = vpack.c.bf16 %v72_v22, %v71_v21  ;;  %v348_v26 = vpack.c.bf16 %v74_v25, %v73_v24  ;;  %v75_v27 = vld [vmem:[#allocation6 + $0x70] sm:$0xff]  ;;  %v76_v28 = vld [vmem:[#allocation6 + $0x78] sm:$0xff]  ;;  %v259_v30 = vld [vmem:[%s528_s2] ss:$0 sm:$0xff] }
  0x3d   :  { %v351_v29 = vpack.c.bf16 %v76_v28, %v75_v27  ;;  %v262_v35 = vld [vmem:[%s530_s4] ss:$0 sm:$0xff] }
  0x3e   :  { %334 = vmatpush3.bf16.msra.mxu1 %v333_v11 }
  0x3f   :  { %335 = vmatprep.subr.bf16.mxu1 %v441_v0 }
  0x42   :  { %337 = vmatpush3.bf16.msra.mxu1 %v336_v14 }
  0x43   :  { %338 = vmatprep.subr.bf16.mxu1 %v441_v0 }
  0x46   :  { %340 = vmatpush3.bf16.msra.mxu1 %v339_v17 }
  0x47   :  { %341 = vmatprep.subr.bf16.mxu1 %v441_v0 }
  0x4a   :  { %343 = vmatpush3.bf16.msra.mxu1 %v342_v20 }
  0x4b   :  { %344 = vmatprep.subr.bf16.mxu1 %v441_v0 }
  0x4e   :  { %346 = vmatpush3.bf16.msra.mxu1 %v345_v23 }
  0x4f   :  { %347 = vmatprep.subr.bf16.mxu1 %v441_v0 }
  0x52   :  { %349 = vmatpush3.bf16.msra.mxu1 %v348_v26 }
  0x53   :  { %350 = vmatprep.subr.bf16.mxu1 %v441_v0 }
  0x56   :  { %352 = vmatpush3.bf16.msra.mxu1 %v351_v29 }
 0x10f   :  { %v159_v31 = vpop.f32.mrb[0].mxu0 }
 0x110   :  { %v160_v32 = vadd.f32 %v259_v30, %v159_v31  ;;  %v289_v33 = vpop.f32.mrb[1].mxu0 }
 0x112   :  { %v163_v34 = vmax.f32 %v160_v32, 0.0 }
 0x114   :  { %323 = vmatmul.mubr.f32.vlgmr.msra.gmra.mrb[0].mxu1 %v163_v34 }
 0x1e7   :  { %v237_v36 = vpop.f32.mrb[0].mxu1 }
 0x1e8   :  { %v238_v37 = vadd.f32 %v262_v35, %v237_v36  ;;  %v324_v38 = vpop.f32.mrb[1].mxu1 }
 0x1ea   :  { %241 = vmax.xlane.f32.xlu0 %v238_v37 }
 0x277   :  { %v242_v39 = vpop.xlane.xlu0 %241 }
 0x278   :  { %v243_v40 = vsub.f32 %v238_v37, %v242_v39 }
 0x27a   :  { %v244_v41 = vmul.f32 1.442695, %v243_v40 }
 0x27c   :  { %362 = vpow2.f32 %v244_v41 }
 0x286   :  { %v363_v42 = vpop.eup %362 }
 0x287   :  { %246 = vadd.xlane.f32.xlu0 %v363_v42 }
 0x314   :  { %v247_v43 = vpop.xlane.xlu0 %246 }
 0x315   :  { %364 = vlog2.f32 %v247_v43 }
 0x31f   :  { %v365_v44 = vpop.eup %364 }
 0x320   :  { %v249_v45 = vmul.f32 0.6931472, %v365_v44 }
 0x322   :  { %v250_v46 = vsub.f32 %v243_v40, %v249_v45 }
 0x324   :  { %252 = vst.msk [vmem:[%s531_s5] sm:$0xff] %vm251_vm5, %v250_v46 }
 0x325   :  { %257 = vsyncpa [#allocation3], 1 }
 0x326   :  { %258 = vsyncpa [#allocation5], 1 }

</bundles_post_ra>
